<compile_context>
chip_gen: v6e
topology: v6e:2x2x1
jax: 0.10.0
libtpu: 0.0.40
codegen_flags: <defaults>
</compile_context>

<pallas_src>
import functools
import math

import numpy as np
import jax
import jax.numpy as jnp
from jax import lax
from jax.experimental import pallas as pl
from jax.experimental.pallas import tpu as pltpu


# -------------------------- fused Pallas kernel --------------------------

def _ghost_kernel(xc_ref, hal_ref, wmask_ref, wt_ref, s1_ref, b1_ref,
                  wdw_ref, s2_ref, b2_ref, o_ref,
                  *, TH, W, Cin, Cinit, Cout, use_mxu):
    """One (batch, row-tile) grid step, lane-flat layout.

    xc_ref   : (1, Cin, TH*W)     interior rows of the tile (lane-flat).
    hal_ref  : (1, 1, Cin, 2*W)   clamped halo rows (row above | row below).
    wmask_ref: (2, TH*W)          keep-masks for the left/right width padding.
    wt_ref   : (Cinit, Cin)       1x1 conv weight (transposed), VMEM.
    s1/b1    : (Cinit, 1)         folded eval-mode BN scale/bias of primary.
    wdw_ref  : (Cnew, 9)          3x3 depthwise taps per channel, VMEM.
    s2/b2    : (Cnew, 1)          folded BN scale/bias of cheap op.
    o_ref    : (1, Cout, TH*W)    output tile; [0,n1) = x1, [n1,Cout) = x2
                                  (fused concat + [:out_planes] slice).
    """
    h = pl.program_id(1)
    nH = pl.num_programs(1)
    L = TH * W
    n1 = min(Cinit, Cout)          # x1 channels surviving [:out_planes]
    n2 = Cout - n1                 # x2 channels surviving [:out_planes]

    # hoisted parameter loads
    wt = wt_ref[...].astype(jnp.float32)     # (Cinit, Cin)
    s1 = s1_ref[...]                         # (Cinit, 1)
    b1 = b1_ref[...]

    def primary(xin):
        """1x1 conv + folded BN + ReLU on a lane-flat (Cin, l) slab -> (Cinit, l)."""
        if use_mxu:
            y = jnp.dot(wt, xin, preferred_element_type=jnp.float32)
        else:
            # tiny Cin*Cinit: pure-VPU broadcast FMAs (no degenerate MXU matmul)
            y = xin[0:1, :] * wt[:, 0:1]
            for c in range(1, Cin):
                y = y + xin[c:c + 1, :] * wt[:, c:c + 1]
        return jnp.maximum(y * s1 + b1, 0.0)

    # ---- primary conv on the interior tile (lane-aligned -> aligned store)
    xc = xc_ref[0, :, :].astype(jnp.float32)          # (Cin, L)
    x1 = primary(xc)                                  # (Cinit, L)

    if n2 > 0:
        # ---- primary conv on the two halo rows; zero them outside the image
        # (the depthwise zero-pads x1, and ReLU(BN(conv(0))) != 0).
        hal = hal_ref[0, 0, :, :].astype(jnp.float32)  # (Cin, 2W)
        x1h = primary(hal)                             # (Cinit, 2W)
        top_gate = (h > 0).astype(jnp.float32)
        bot_gate = (h < nH - 1).astype(jnp.float32)
        x1_top = x1h[:n2, :W] * top_gate               # (n2, W)
        x1_bot = x1h[:n2, W:] * bot_gate               # (n2, W)

        # Depthwise source slab: [0 | top row | interior | bottom row | 0]
        # (one concat for ALL channels; the stored x1 above never touches it).
        zc = jnp.zeros((n2, 1), jnp.float32)
        src = jnp.concatenate([zc, x1_top, x1[:n2], x1_bot, zc], axis=1)  # (n2, L+2W+2)

        keep_l = wmask_ref[0:1, :]                     # 0 at width col 0
        keep_r = wmask_ref[1:2, :]                     # 0 at width col W-1

        # ---- cheap operation: 3x3 depthwise conv + BN + ReLU, all channels.
        # Each tap is one lane-shifted slice of `src`; width zero-padding (and
        # all row-wrap artifacts of the flat layout) are handled by keep masks.
        wdw = wdw_ref[...]                             # (Cnew, 9)
        s2 = s2_ref[...]
        b2 = b2_ref[...]
        acc = jnp.zeros((n2, L), jnp.float32)
        for dy in range(3):
            for dx in range(3):
                t = src[:, dy * W + dx: dy * W + dx + L]
                if dx == 0:
                    t = t * keep_l
                elif dx == 2:
                    t = t * keep_r
                acc = acc + t * wdw[:n2, dy * 3 + dx: dy * 3 + dx + 1]
        x2 = jnp.maximum(acc * s2[:n2] + b2[:n2], 0.0)

        out_tile = jnp.concatenate([x1[:n1], x2], axis=0)   # (Cout, L)
    else:
        out_tile = x1[:n1]

    # one dense, lane-aligned store of the whole tile (fused concat + slice)
    o_ref[0, :, :] = out_tile.astype(o_ref.dtype)


# -------------------------- tiling / wrapper --------------------------

def _vmem_capacity_bytes():
    try:
        return int(pltpu.get_tpu_info().vmem_capacity_bytes)
    except Exception:
        return 64 * 1024 * 1024     # conservative: v7x per-TensorCore VMEM


def _choose_tile_h(N, H, W, Cin, Cout, budget_bytes):
    """Largest divisor of H whose blocks fit the VMEM budget, preferring
    lane-dense (TH*W % 128 == 0) tiles; H is only split further when the batch
    axis alone would give fewer than 2 parallel grid steps (v7x has 2 TCs)."""
    divisors = [d for d in range(1, H + 1) if H % d == 0]

    def tile_bytes(th):
        l = th * W
        # double-buffered in/out blocks + a handful of f32 working slabs
        return 4 * l * (2 * Cin + 2 * Cout + 4 * max(Cin, Cout))

    fitting = [d for d in divisors if tile_bytes(d) <= budget_bytes] or [divisors[0]]

    def pick(cands):
        dense = [d for d in cands if (d * W) % 128 == 0]
        return max(dense) if dense else max(cands)

    th = pick(fitting)
    if N * (H // th) < 2:
        multi = [d for d in fitting if H // d >= 2]
        if multi:
            th = pick(multi)
    return th


def ghost_module(x_nchw, params, out_planes):
    """Fused GhostModule forward.  NCHW in, NCHW out (no layout transposes)."""
    N, Cin, H, W = x_nchw.shape
    w_pw = params["w_pw"]                               # (Cin, Cinit)
    Cinit = w_pw.shape[1]
    w_dw = params["w_dw"].reshape(params["w_dw"].shape[0], 9)   # (Cnew, 9)
    Cnew = w_dw.shape[0]
    assert Cnew == Cinit, "only ratio=2 is implemented"  # TODO(synk): general ratio
    Cout = out_planes
    n1 = min(Cinit, Cout)
    n2 = Cout - n1
    assert n2 <= Cnew

    vmem_cap = _vmem_capacity_bytes()
    vmem_limit = int(min(vmem_cap * 3 // 4, 96 * 1024 * 1024))
    TH = _choose_tile_h(N, H, W, Cin, Cout, budget_bytes=vmem_limit // 3)
    nH = H // TH
    L = TH * W
    use_mxu = (Cin * Cinit >= 256)      # MXU for non-toy widths, VPU FMAs otherwise

    # Lane-flat views: contiguous reshapes only (free), no transposes.
    x_flat = x_nchw.reshape(N, Cin, H * W)

    # Single-row halo gather: the clamped rows h*TH-1 / h*TH+TH for every tile,
    # laid out so each grid step DMAs exactly one tiny (Cin, 2W) block.
    rows = []
    for hh in range(nH):
        rows += [max(hh * TH - 1, 0), min((hh + 1) * TH, H - 1)]
    rows = np.asarray(rows, dtype=np.int32)
    halo = x_nchw[:, :, rows, :].reshape(N, Cin, nH, 2 * W)
    halo = jnp.transpose(halo, (0, 2, 1, 3))            # (N, nH, Cin, 2W)

    # Width zero-padding keep-masks for the dx=0 / dx=2 depthwise taps
    # (precomputed host-side; also covers flat-layout row-wrap positions).
    col = np.tile(np.arange(W), TH)
    wmask = jnp.asarray(np.stack([(col != 0), (col != W - 1)]).astype(np.float32))

    w_t = jnp.transpose(w_pw, (1, 0))                   # (Cinit, Cin), VMEM
    s1 = params["scale1"].reshape(Cinit, 1)
    b1 = params["bias1"].reshape(Cinit, 1)
    s2 = params["scale2"].reshape(Cnew, 1)
    b2 = params["bias2"].reshape(Cnew, 1)

    kern = functools.partial(_ghost_kernel, TH=TH, W=W, Cin=Cin,
                             Cinit=Cinit, Cout=Cout, use_mxu=use_mxu)

    M = N * H * W
    Mh = N * nH * 2 * W
    cost = pl.CostEstimate(
        flops=2 * Cin * Cinit * (M + Mh) + 3 * Cinit * (M + Mh) + 21 * n2 * M,
        transcendentals=0,
        bytes_accessed=4 * (Cin * (M + Mh) + Cout * M),
    )

    def full(a):
        nd = a.ndim
        return pl.BlockSpec(a.shape, lambda n, h: (0,) * nd)

    out_flat = pl.pallas_call(
        kern,
        out_shape=jax.ShapeDtypeStruct((N, Cout, H * W), x_nchw.dtype),
        grid_spec=pl.GridSpec(
            grid=(N, nH),
            in_specs=[
                # interior rows of the tile, lane-flat (last dim multiple of 128)
                pl.BlockSpec((1, Cin, L), lambda n, h: (n, 0, h)),
                # the two clamped halo rows of this tile only
                pl.BlockSpec((1, 1, Cin, 2 * W), lambda n, h: (n, h, 0, 0)),
                full(wmask),
                full(w_t), full(s1), full(b1),
                full(w_dw), full(s2), full(b2),
            ],
            out_specs=pl.BlockSpec((1, Cout, L), lambda n, h: (n, 0, h)),
        ),
        compiler_params=pltpu.CompilerParams(
            dimension_semantics=("parallel", "parallel"),
            vmem_limit_bytes=vmem_limit),
        cost_estimate=cost,
        # default double-buffering is kept; raise pipeline depth only if an
        # xprof trace shows exposed DMA (review guidance).
    )(x_flat, halo, wmask, w_t, s1, b1, w_dw, s2, b2)

    return out_flat.reshape(N, Cout, H, W)


# -------------------------- parameter setup --------------------------

def make_params(key, in_planes, out_planes, ratio=2, eps=1e-5):
    init_channels = math.ceil(out_planes / ratio)
    new_channels = init_channels * (ratio - 1)
    ks = jax.random.split(key, 10)
    # primary conv weight, PyTorch (init_channels, in_planes, 1, 1) -> (Cin, Cinit)
    w_pw = 0.2 * jax.random.normal(ks[0], (in_planes, init_channels), jnp.float32)
    # depthwise conv weight, PyTorch (new_channels, 1, 3, 3) -> (Cnew, 3, 3)
    w_dw = 0.2 * jax.random.normal(ks[1], (new_channels, 3, 3), jnp.float32)
    # BatchNorm (eval-mode) params, folded into scale/bias
    g1 = 1.0 + 0.1 * jax.random.normal(ks[2], (init_channels,), jnp.float32)
    b1 = 0.1 * jax.random.normal(ks[3], (init_channels,), jnp.float32)
    m1 = 0.1 * jax.random.normal(ks[4], (init_channels,), jnp.float32)
    v1 = 1.0 + 0.1 * jax.random.uniform(ks[5], (init_channels,), jnp.float32)
    g2 = 1.0 + 0.1 * jax.random.normal(ks[6], (new_channels,), jnp.float32)
    b2 = 0.1 * jax.random.normal(ks[7], (new_channels,), jnp.float32)
    m2 = 0.1 * jax.random.normal(ks[8], (new_channels,), jnp.float32)
    v2 = 1.0 + 0.1 * jax.random.uniform(ks[9], (new_channels,), jnp.float32)
    scale1 = g1 / jnp.sqrt(v1 + eps)
    bias1 = b1 - m1 * scale1
    scale2 = g2 / jnp.sqrt(v2 + eps)
    bias2 = b2 - m2 * scale2
    return dict(w_pw=w_pw, w_dw=w_dw, scale1=scale1, bias1=bias1,
                scale2=scale2, bias2=bias2), init_channels, new_channels


# -------------------------- pure-JAX reference --------------------------

def ghost_reference(x_nchw, params, out_planes, init_channels):
    # primary: 1x1 conv + BN + ReLU
    x1 = jnp.einsum("nchw,cd->ndhw", x_nchw, params["w_pw"])
    x1 = x1 * params["scale1"][None, :, None, None] + params["bias1"][None, :, None, None]
    x1 = jnp.maximum(x1, 0.0)
    # cheap: depthwise 3x3 conv + BN + ReLU
    w_dw_oihw = params["w_dw"][:, None, :, :]                       # (Cnew,1,3,3)
    x2 = lax.conv_general_dilated(
        x1, w_dw_oihw, window_strides=(1, 1), padding=((1, 1), (1, 1)),
        feature_group_count=init_channels,
        dimension_numbers=("NCHW", "OIHW", "NCHW"))
    x2 = x2 * params["scale2"][None, :, None, None] + params["bias2"][None, :, None, None]
    x2 = jnp.maximum(x2, 0.0)
    return jnp.concatenate([x1, x2], axis=1)[:, :out_planes, :, :]


# -------------------------- main --------------------------

if __name__ == "__main__":
    N, in_planes, H, W = 2, 4, 16, 16
    out_planes = 8

    key = jax.random.PRNGKey(0)
    kx, kp = jax.random.split(key)
    x = jax.random.normal(kx, (N, in_planes, H, W), jnp.float32)   # NCHW like PyTorch

    params, init_channels, new_channels = make_params(kp, in_planes, out_planes)

    fwd = jax.jit(functools.partial(ghost_module, params=params, out_planes=out_planes))
    out = jax.block_until_ready(fwd(x))

    ref = ghost_reference(x, params, out_planes, init_channels)
    assert out.shape == (N, out_planes, H, W), out.shape
    assert jnp.allclose(out, ref, atol=1e-5, rtol=1e-5), float(jnp.max(jnp.abs(out - ref)))

    print("KERNEL_OK")
</pallas_src>

<mosaic_0001>
module attributes {stable_mosaic.version = 11 : i64} {
  func.func @_ghost_kernel(%arg0: i32, %arg1: i32, %arg2: memref<1x4x256xf32, #tpu.memory_space<vmem>>, %arg3: memref<1x1x4x32xf32, #tpu.memory_space<vmem>>, %arg4: memref<2x256xf32, #tpu.memory_space<vmem>>, %arg5: memref<4x4xf32, #tpu.memory_space<vmem>>, %arg6: memref<4x1xf32, #tpu.memory_space<vmem>>, %arg7: memref<4x1xf32, #tpu.memory_space<vmem>>, %arg8: memref<4x9xf32, #tpu.memory_space<vmem>>, %arg9: memref<4x1xf32, #tpu.memory_space<vmem>>, %arg10: memref<4x1xf32, #tpu.memory_space<vmem>>, %arg11: memref<1x8x256xf32, #tpu.memory_space<vmem>>) attributes {dimension_semantics = [#tpu.dimension_semantics<parallel>, #tpu.dimension_semantics<parallel>], iteration_bounds = array<i64: 2, 1>, scalar_prefetch = 0 : i64, scratch_operands = 0 : i64, tpu.core_type = #tpu.core_type<tc>, window_params = [{transform_indices = @transform_0, window_bounds = array<i64: 1, 4, 256>}, {transform_indices = @transform_1, window_bounds = array<i64: 1, 1, 4, 32>}, {pipeline_mode = #tpu.pipeline_mode<synchronous>, transform_indices = @transform_2, window_bounds = array<i64: 2, 256>}, {pipeline_mode = #tpu.pipeline_mode<synchronous>, transform_indices = @transform_3, window_bounds = array<i64: 4, 4>}, {pipeline_mode = #tpu.pipeline_mode<synchronous>, transform_indices = @transform_4, window_bounds = array<i64: 4, 1>}, {pipeline_mode = #tpu.pipeline_mode<synchronous>, transform_indices = @transform_5, window_bounds = array<i64: 4, 1>}, {pipeline_mode = #tpu.pipeline_mode<synchronous>, transform_indices = @transform_6, window_bounds = array<i64: 4, 9>}, {pipeline_mode = #tpu.pipeline_mode<synchronous>, transform_indices = @transform_7, window_bounds = array<i64: 4, 1>}, {pipeline_mode = #tpu.pipeline_mode<synchronous>, transform_indices = @transform_8, window_bounds = array<i64: 4, 1>}, {transform_indices = @transform_9, window_bounds = array<i64: 1, 8, 256>}]} {
    %c0 = arith.constant 0 : index
    %c0_0 = arith.constant 0 : index
    %0 = vector.load %arg5[%c0, %c0_0] : memref<4x4xf32, #tpu.memory_space<vmem>>, vector<4x4xf32>
    %c0_1 = arith.constant 0 : index
    %c0_2 = arith.constant 0 : index
    %1 = vector.load %arg6[%c0_1, %c0_2] : memref<4x1xf32, #tpu.memory_space<vmem>>, vector<4x1xf32>
    %c0_3 = arith.constant 0 : index
    %c0_4 = arith.constant 0 : index
    %2 = vector.load %arg7[%c0_3, %c0_4] : memref<4x1xf32, #tpu.memory_space<vmem>>, vector<4x1xf32>
    %c0_5 = arith.constant 0 : index
    %c0_6 = arith.constant 0 : index
    %c0_7 = arith.constant 0 : index
    %3 = vector.load %arg2[%c0_5, %c0_6, %c0_7] : memref<1x4x256xf32, #tpu.memory_space<vmem>>, vector<1x4x256xf32>
    %4 = vector.shape_cast %3 : vector<1x4x256xf32> to vector<4x256xf32>
    %5 = vector.extract_strided_slice %4 {offsets = [0, 0], sizes = [1, 256], strides = [1, 1]} : vector<4x256xf32> to vector<1x256xf32>
    %6 = vector.extract_strided_slice %0 {offsets = [0, 0], sizes = [4, 1], strides = [1, 1]} : vector<4x4xf32> to vector<4x1xf32>
    %7 = vector.broadcast %5 : vector<1x256xf32> to vector<4x256xf32>
    %8 = vector.broadcast %6 : vector<4x1xf32> to vector<4x256xf32>
    %9 = arith.mulf %7, %8 : vector<4x256xf32>
    %10 = vector.extract_strided_slice %4 {offsets = [1, 0], sizes = [1, 256], strides = [1, 1]} : vector<4x256xf32> to vector<1x256xf32>
    %11 = vector.extract_strided_slice %0 {offsets = [0, 1], sizes = [4, 1], strides = [1, 1]} : vector<4x4xf32> to vector<4x1xf32>
    %12 = vector.broadcast %10 : vector<1x256xf32> to vector<4x256xf32>
    %13 = vector.broadcast %11 : vector<4x1xf32> to vector<4x256xf32>
    %14 = arith.mulf %12, %13 : vector<4x256xf32>
    %15 = arith.addf %9, %14 : vector<4x256xf32>
    %16 = vector.extract_strided_slice %4 {offsets = [2, 0], sizes = [1, 256], strides = [1, 1]} : vector<4x256xf32> to vector<1x256xf32>
    %17 = vector.extract_strided_slice %0 {offsets = [0, 2], sizes = [4, 1], strides = [1, 1]} : vector<4x4xf32> to vector<4x1xf32>
    %18 = vector.broadcast %16 : vector<1x256xf32> to vector<4x256xf32>
    %19 = vector.broadcast %17 : vector<4x1xf32> to vector<4x256xf32>
    %20 = arith.mulf %18, %19 : vector<4x256xf32>
    %21 = arith.addf %15, %20 : vector<4x256xf32>
    %22 = vector.extract_strided_slice %4 {offsets = [3, 0], sizes = [1, 256], strides = [1, 1]} : vector<4x256xf32> to vector<1x256xf32>
    %23 = vector.extract_strided_slice %0 {offsets = [0, 3], sizes = [4, 1], strides = [1, 1]} : vector<4x4xf32> to vector<4x1xf32>
    %24 = vector.broadcast %22 : vector<1x256xf32> to vector<4x256xf32>
    %25 = vector.broadcast %23 : vector<4x1xf32> to vector<4x256xf32>
    %26 = arith.mulf %24, %25 : vector<4x256xf32>
    %27 = arith.addf %21, %26 : vector<4x256xf32>
    %28 = vector.broadcast %1 : vector<4x1xf32> to vector<4x256xf32>
    %29 = arith.mulf %27, %28 : vector<4x256xf32>
    %30 = vector.broadcast %2 : vector<4x1xf32> to vector<4x256xf32>
    %31 = arith.addf %29, %30 : vector<4x256xf32>
    %cst = arith.constant 0.000000e+00 : f32
    %32 = vector.broadcast %cst : f32 to vector<4x256xf32>
    %33 = arith.maximumf %31, %32 : vector<4x256xf32>
    %c0_8 = arith.constant 0 : index
    %c0_9 = arith.constant 0 : index
    %c0_10 = arith.constant 0 : index
    %c0_11 = arith.constant 0 : index
    %34 = vector.load %arg3[%c0_8, %c0_9, %c0_10, %c0_11] : memref<1x1x4x32xf32, #tpu.memory_space<vmem>>, vector<1x1x4x32xf32>
    %35 = vector.shape_cast %34 : vector<1x1x4x32xf32> to vector<4x32xf32>
    %36 = vector.extract_strided_slice %35 {offsets = [0, 0], sizes = [1, 32], strides = [1, 1]} : vector<4x32xf32> to vector<1x32xf32>
    %37 = vector.extract_strided_slice %0 {offsets = [0, 0], sizes = [4, 1], strides = [1, 1]} : vector<4x4xf32> to vector<4x1xf32>
    %38 = vector.broadcast %36 : vector<1x32xf32> to vector<4x32xf32>
    %39 = vector.broadcast %37 : vector<4x1xf32> to vector<4x32xf32>
    %40 = arith.mulf %38, %39 : vector<4x32xf32>
    %41 = vector.extract_strided_slice %35 {offsets = [1, 0], sizes = [1, 32], strides = [1, 1]} : vector<4x32xf32> to vector<1x32xf32>
    %42 = vector.extract_strided_slice %0 {offsets = [0, 1], sizes = [4, 1], strides = [1, 1]} : vector<4x4xf32> to vector<4x1xf32>
    %43 = vector.broadcast %41 : vector<1x32xf32> to vector<4x32xf32>
    %44 = vector.broadcast %42 : vector<4x1xf32> to vector<4x32xf32>
    %45 = arith.mulf %43, %44 : vector<4x32xf32>
    %46 = arith.addf %40, %45 : vector<4x32xf32>
    %47 = vector.extract_strided_slice %35 {offsets = [2, 0], sizes = [1, 32], strides = [1, 1]} : vector<4x32xf32> to vector<1x32xf32>
    %48 = vector.extract_strided_slice %0 {offsets = [0, 2], sizes = [4, 1], strides = [1, 1]} : vector<4x4xf32> to vector<4x1xf32>
    %49 = vector.broadcast %47 : vector<1x32xf32> to vector<4x32xf32>
    %50 = vector.broadcast %48 : vector<4x1xf32> to vector<4x32xf32>
    %51 = arith.mulf %49, %50 : vector<4x32xf32>
    %52 = arith.addf %46, %51 : vector<4x32xf32>
    %53 = vector.extract_strided_slice %35 {offsets = [3, 0], sizes = [1, 32], strides = [1, 1]} : vector<4x32xf32> to vector<1x32xf32>
    %54 = vector.extract_strided_slice %0 {offsets = [0, 3], sizes = [4, 1], strides = [1, 1]} : vector<4x4xf32> to vector<4x1xf32>
    %55 = vector.broadcast %53 : vector<1x32xf32> to vector<4x32xf32>
    %56 = vector.broadcast %54 : vector<4x1xf32> to vector<4x32xf32>
    %57 = arith.mulf %55, %56 : vector<4x32xf32>
    %58 = arith.addf %52, %57 : vector<4x32xf32>
    %59 = vector.broadcast %1 : vector<4x1xf32> to vector<4x32xf32>
    %60 = arith.mulf %58, %59 : vector<4x32xf32>
    %61 = vector.broadcast %2 : vector<4x1xf32> to vector<4x32xf32>
    %62 = arith.addf %60, %61 : vector<4x32xf32>
    %cst_12 = arith.constant 0.000000e+00 : f32
    %63 = vector.broadcast %cst_12 : f32 to vector<4x32xf32>
    %64 = arith.maximumf %62, %63 : vector<4x32xf32>
    %c0_i32 = arith.constant 0 : i32
    %65 = arith.cmpi sgt, %arg1, %c0_i32 : i32
    %66 = arith.extui %65 : i1 to i32
    %67 = arith.sitofp %66 : i32 to f32
    %c0_i32_13 = arith.constant 0 : i32
    %68 = arith.cmpi slt, %arg1, %c0_i32_13 : i32
    %69 = arith.extui %68 : i1 to i32
    %70 = arith.sitofp %69 : i32 to f32
    %71 = vector.extract_strided_slice %64 {offsets = [0, 0], sizes = [4, 16], strides = [1, 1]} : vector<4x32xf32> to vector<4x16xf32>
    %72 = vector.broadcast %67 : f32 to vector<4x16xf32>
    %73 = arith.mulf %71, %72 : vector<4x16xf32>
    %74 = vector.extract_strided_slice %64 {offsets = [0, 16], sizes = [4, 16], strides = [1, 1]} : vector<4x32xf32> to vector<4x16xf32>
    %75 = vector.broadcast %70 : f32 to vector<4x16xf32>
    %76 = arith.mulf %74, %75 : vector<4x16xf32>
    %cst_14 = arith.constant 0.000000e+00 : f32
    %77 = vector.broadcast %cst_14 : f32 to vector<4x1xf32>
    %78 = tpu.concatenate %77, %73, %33, %76, %77 in 1 : vector<4x1xf32>, vector<4x16xf32>, vector<4x256xf32>, vector<4x16xf32>, vector<4x1xf32> -> vector<4x290xf32>
    %c0_15 = arith.constant 0 : index
    %c0_16 = arith.constant 0 : index
    %79 = vector.load %arg4[%c0_15, %c0_16] : memref<2x256xf32, #tpu.memory_space<vmem>>, vector<1x256xf32>
    %c1 = arith.constant 1 : index
    %c0_17 = arith.constant 0 : index
    %80 = vector.load %arg4[%c1, %c0_17] : memref<2x256xf32, #tpu.memory_space<vmem>>, vector<1x256xf32>
    %c0_18 = arith.constant 0 : index
    %c0_19 = arith.constant 0 : index
    %81 = vector.load %arg8[%c0_18, %c0_19] : memref<4x9xf32, #tpu.memory_space<vmem>>, vector<4x9xf32>
    %c0_20 = arith.constant 0 : index
    %c0_21 = arith.constant 0 : index
    %82 = vector.load %arg9[%c0_20, %c0_21] : memref<4x1xf32, #tpu.memory_space<vmem>>, vector<4x1xf32>
    %c0_22 = arith.constant 0 : index
    %c0_23 = arith.constant 0 : index
    %83 = vector.load %arg10[%c0_22, %c0_23] : memref<4x1xf32, #tpu.memory_space<vmem>>, vector<4x1xf32>
    %cst_24 = arith.constant 0.000000e+00 : f32
    %84 = vector.broadcast %cst_24 : f32 to vector<4x256xf32>
    %85 = vector.extract_strided_slice %78 {offsets = [0, 0], sizes = [4, 256], strides = [1, 1]} : vector<4x290xf32> to vector<4x256xf32>
    %86 = vector.broadcast %79 : vector<1x256xf32> to vector<4x256xf32>
    %87 = arith.mulf %85, %86 : vector<4x256xf32>
    %88 = vector.extract_strided_slice %81 {offsets = [0, 0], sizes = [4, 1], strides = [1, 1]} : vector<4x9xf32> to vector<4x1xf32>
    %89 = vector.broadcast %88 : vector<4x1xf32> to vector<4x256xf32>
    %90 = arith.mulf %87, %89 : vector<4x256xf32>
    %91 = arith.addf %84, %90 : vector<4x256xf32>
    %92 = vector.extract_strided_slice %78 {offsets = [0, 1], sizes = [4, 256], strides = [1, 1]} : vector<4x290xf32> to vector<4x256xf32>
    %93 = vector.extract_strided_slice %81 {offsets = [0, 1], sizes = [4, 1], strides = [1, 1]} : vector<4x9xf32> to vector<4x1xf32>
    %94 = vector.broadcast %93 : vector<4x1xf32> to vector<4x256xf32>
    %95 = arith.mulf %92, %94 : vector<4x256xf32>
    %96 = arith.addf %91, %95 : vector<4x256xf32>
    %97 = vector.extract_strided_slice %78 {offsets = [0, 2], sizes = [4, 256], strides = [1, 1]} : vector<4x290xf32> to vector<4x256xf32>
    %98 = vector.broadcast %80 : vector<1x256xf32> to vector<4x256xf32>
    %99 = arith.mulf %97, %98 : vector<4x256xf32>
    %100 = vector.extract_strided_slice %81 {offsets = [0, 2], sizes = [4, 1], strides = [1, 1]} : vector<4x9xf32> to vector<4x1xf32>
    %101 = vector.broadcast %100 : vector<4x1xf32> to vector<4x256xf32>
    %102 = arith.mulf %99, %101 : vector<4x256xf32>
    %103 = arith.addf %96, %102 : vector<4x256xf32>
    %104 = vector.extract_strided_slice %78 {offsets = [0, 16], sizes = [4, 256], strides = [1, 1]} : vector<4x290xf32> to vector<4x256xf32>
    %105 = vector.broadcast %79 : vector<1x256xf32> to vector<4x256xf32>
    %106 = arith.mulf %104, %105 : vector<4x256xf32>
    %107 = vector.extract_strided_slice %81 {offsets = [0, 3], sizes = [4, 1], strides = [1, 1]} : vector<4x9xf32> to vector<4x1xf32>
    %108 = vector.broadcast %107 : vector<4x1xf32> to vector<4x256xf32>
    %109 = arith.mulf %106, %108 : vector<4x256xf32>
    %110 = arith.addf %103, %109 : vector<4x256xf32>
    %111 = vector.extract_strided_slice %78 {offsets = [0, 17], sizes = [4, 256], strides = [1, 1]} : vector<4x290xf32> to vector<4x256xf32>
    %112 = vector.extract_strided_slice %81 {offsets = [0, 4], sizes = [4, 1], strides = [1, 1]} : vector<4x9xf32> to vector<4x1xf32>
    %113 = vector.broadcast %112 : vector<4x1xf32> to vector<4x256xf32>
    %114 = arith.mulf %111, %113 : vector<4x256xf32>
    %115 = arith.addf %110, %114 : vector<4x256xf32>
    %116 = vector.extract_strided_slice %78 {offsets = [0, 18], sizes = [4, 256], strides = [1, 1]} : vector<4x290xf32> to vector<4x256xf32>
    %117 = vector.broadcast %80 : vector<1x256xf32> to vector<4x256xf32>
    %118 = arith.mulf %116, %117 : vector<4x256xf32>
    %119 = vector.extract_strided_slice %81 {offsets = [0, 5], sizes = [4, 1], strides = [1, 1]} : vector<4x9xf32> to vector<4x1xf32>
    %120 = vector.broadcast %119 : vector<4x1xf32> to vector<4x256xf32>
    %121 = arith.mulf %118, %120 : vector<4x256xf32>
    %122 = arith.addf %115, %121 : vector<4x256xf32>
    %123 = vector.extract_strided_slice %78 {offsets = [0, 32], sizes = [4, 256], strides = [1, 1]} : vector<4x290xf32> to vector<4x256xf32>
    %124 = vector.broadcast %79 : vector<1x256xf32> to vector<4x256xf32>
    %125 = arith.mulf %123, %124 : vector<4x256xf32>
    %126 = vector.extract_strided_slice %81 {offsets = [0, 6], sizes = [4, 1], strides = [1, 1]} : vector<4x9xf32> to vector<4x1xf32>
    %127 = vector.broadcast %126 : vector<4x1xf32> to vector<4x256xf32>
    %128 = arith.mulf %125, %127 : vector<4x256xf32>
    %129 = arith.addf %122, %128 : vector<4x256xf32>
    %130 = vector.extract_strided_slice %78 {offsets = [0, 33], sizes = [4, 256], strides = [1, 1]} : vector<4x290xf32> to vector<4x256xf32>
    %131 = vector.extract_strided_slice %81 {offsets = [0, 7], sizes = [4, 1], strides = [1, 1]} : vector<4x9xf32> to vector<4x1xf32>
    %132 = vector.broadcast %131 : vector<4x1xf32> to vector<4x256xf32>
    %133 = arith.mulf %130, %132 : vector<4x256xf32>
    %134 = arith.addf %129, %133 : vector<4x256xf32>
    %135 = vector.extract_strided_slice %78 {offsets = [0, 34], sizes = [4, 256], strides = [1, 1]} : vector<4x290xf32> to vector<4x256xf32>
    %136 = vector.broadcast %80 : vector<1x256xf32> to vector<4x256xf32>
    %137 = arith.mulf %135, %136 : vector<4x256xf32>
    %138 = vector.extract_strided_slice %81 {offsets = [0, 8], sizes = [4, 1], strides = [1, 1]} : vector<4x9xf32> to vector<4x1xf32>
    %139 = vector.broadcast %138 : vector<4x1xf32> to vector<4x256xf32>
    %140 = arith.mulf %137, %139 : vector<4x256xf32>
    %141 = arith.addf %134, %140 : vector<4x256xf32>
    %142 = vector.broadcast %82 : vector<4x1xf32> to vector<4x256xf32>
    %143 = arith.mulf %141, %142 : vector<4x256xf32>
    %144 = vector.broadcast %83 : vector<4x1xf32> to vector<4x256xf32>
    %145 = arith.addf %143, %144 : vector<4x256xf32>
    %cst_25 = arith.constant 0.000000e+00 : f32
    %146 = vector.broadcast %cst_25 : f32 to vector<4x256xf32>
    %147 = arith.maximumf %145, %146 : vector<4x256xf32>
    %148 = tpu.concatenate %33, %147 in 0 : vector<4x256xf32>, vector<4x256xf32> -> vector<8x256xf32>
    %c0_26 = arith.constant 0 : index
    %c0_27 = arith.constant 0 : index
    %c0_28 = arith.constant 0 : index
    %149 = vector.load %arg11[%c0_26, %c0_27, %c0_28] : memref<1x8x256xf32, #tpu.memory_space<vmem>>, vector<1x8x256xf32>
    %150 = vector.shape_cast %149 : vector<1x8x256xf32> to vector<8x256xf32>
    %151 = vector.shape_cast %148 : vector<8x256xf32> to vector<1x8x256xf32>
    tpu.vector_store %arg11[%c0_26, %c0_27, %c0_28], %151 {strides = array<i32>} : memref<1x8x256xf32, #tpu.memory_space<vmem>>, vector<1x8x256xf32>,
    return
  }
  func.func @transform_0(%arg0: i32, %arg1: i32) -> (i32, i32, i32) {
    %c0_i32 = arith.constant 0 : i32
    %c0_i32_0 = arith.constant 0 : i32
    return %arg0, %c0_i32, %arg1 : i32, i32, i32
  }
  func.func @transform_1(%arg0: i32, %arg1: i32) -> (i32, i32, i32, i32) {
    %c0_i32 = arith.constant 0 : i32
    %c0_i32_0 = arith.constant 0 : i32
    %c0_i32_1 = arith.constant 0 : i32
    return %arg0, %arg1, %c0_i32, %c0_i32_0 : i32, i32, i32, i32
  }
  func.func @transform_2(%arg0: i32, %arg1: i32) -> (i32, i32) {
    %c0_i32 = arith.constant 0 : i32
    %c0_i32_0 = arith.constant 0 : i32
    %c0_i32_1 = arith.constant 0 : i32
    return %c0_i32, %c0_i32_0 : i32, i32
  }
  func.func @transform_3(%arg0: i32, %arg1: i32) -> (i32, i32) {
    %c0_i32 = arith.constant 0 : i32
    %c0_i32_0 = arith.constant 0 : i32
    %c0_i32_1 = arith.constant 0 : i32
    return %c0_i32, %c0_i32_0 : i32, i32
  }
  func.func @transform_4(%arg0: i32, %arg1: i32) -> (i32, i32) {
    %c0_i32 = arith.constant 0 : i32
    %c0_i32_0 = arith.constant 0 : i32
    %c0_i32_1 = arith.constant 0 : i32
    return %c0_i32, %c0_i32_0 : i32, i32
  }
  func.func @transform_5(%arg0: i32, %arg1: i32) -> (i32, i32) {
    %c0_i32 = arith.constant 0 : i32
    %c0_i32_0 = arith.constant 0 : i32
    %c0_i32_1 = arith.constant 0 : i32
    return %c0_i32, %c0_i32_0 : i32, i32
  }
  func.func @transform_6(%arg0: i32, %arg1: i32) -> (i32, i32) {
    %c0_i32 = arith.constant 0 : i32
    %c0_i32_0 = arith.constant 0 : i32
    %c0_i32_1 = arith.constant 0 : i32
    return %c0_i32, %c0_i32_0 : i32, i32
  }
  func.func @transform_7(%arg0: i32, %arg1: i32) -> (i32, i32) {
    %c0_i32 = arith.constant 0 : i32
    %c0_i32_0 = arith.constant 0 : i32
    %c0_i32_1 = arith.constant 0 : i32
    return %c0_i32, %c0_i32_0 : i32, i32
  }
  func.func @transform_8(%arg0: i32, %arg1: i32) -> (i32, i32) {
    %c0_i32 = arith.constant 0 : i32
    %c0_i32_0 = arith.constant 0 : i32
    %c0_i32_1 = arith.constant 0 : i32
    return %c0_i32, %c0_i32_0 : i32, i32
  }
  func.func @transform_9(%arg0: i32, %arg1: i32) -> (i32, i32, i32) {
    %c0_i32 = arith.constant 0 : i32
    %c0_i32_0 = arith.constant 0 : i32
    return %arg0, %c0_i32, %arg1 : i32, i32, i32
  }
}

</mosaic_0001>

<bundles_post_ra>
// kernel: ghost_module.1
= control target key start
LH: loop header
LB: loop body
LE: loop exit
PB: predicated region body
PF: predicated region fallthrough
CT: control target
= control target key end

     0   :  { %s1173_s30 = smov 0   ;;  %s1175_s10 = smov 0   ;;  %s1439_s0 = inlined_call_operand.vmem [shape: f32[2,4,256], index: 0, kind: input, shape index: {}]   ;;  %s1440_s1 = inlined_call_operand.vmem [shape: f32[2,1,4,32], index: 1, kind: input, shape index: {}]   ;;  %s1441_s2 = inlined_call_operand.vmem [shape: f32[2,256], index: 2, kind: input, shape index: {}]   ;;  %s1442_s3 = inlined_call_operand.vmem [shape: f32[4,4], index: 3, kind: input, shape index: {}]   ;;  %s1443_s4 = inlined_call_operand.vmem [shape: f32[4,1], index: 4, kind: input, shape index: {}]   ;;  %s1444_s5 = inlined_call_operand.vmem [shape: f32[4,1], index: 5, kind: input, shape index: {}]   ;;  %s1445_s6 = inlined_call_operand.vmem [shape: f32[4,9], index: 6, kind: input, shape index: {}]   ;;  %s1446_s7 = inlined_call_operand.vmem [shape: f32[4,1], index: 7, kind: input, shape index: {}]   ;;  %s1447_s8 = inlined_call_operand.vmem [shape: f32[4,1], index: 8, kind: input, shape index: {}]   ;;  %s1448_s9 = inlined_call_operand.vmem [shape: f32[2,8,256], index: 9, kind: output, shape index: {}]  }
   0x1   :  { %s1177_s11 = smov 0  }
   0x2 LB: > { %s31_s12 = sadd.s32 1, %s1093_s10  ;;  %p1000_p0 = scmp.ge.s32.totalorder %s1097_s11, 1  ;;  %s1097_s11 = sphi %s1177_s11, %s19_s11   ;;  %s1093_s10 = sphi %s1175_s10, %s1450_s10   ;;  %s1089_s30 = sphi %s1173_s30, %s1449_s30  }
   0x3   : > { %p33_p1 = scmp.ge.s32.totalorder %s31_s12, 2  ;;  %p322_p2 = scmp.lt.s32.totalorder %s1097_s11, 3 }
   0x5   : > { %s1452_s12 = smov (%p33_p1, %s31_s12), 0  ;;  %p323_p3 = pnand %p1000_p0, %p322_p2 }
   0x6   : > { %p374_p4 = scmp.lt.s32.totalorder (!%p323_p3), %s1089_s30, 1  ;;  %s1103_s27 = smov (!%p323_p3), 2  }
   0x7   : > { %326 = sbr.rel (%p323_p3) target bundleno = 469 (0x1d5), region = 56  ;;  %s1106_s13 = smov (!%p323_p3), 18  }
   0x8   : > { %s1107_s14 = smov (!%p323_p3), 16   ;;  %s1111_s19 = smov (!%p323_p3), 17  }
   0x9   : > { %s1112_s20 = smov (!%p323_p3), 1   ;;  %s1113_s21 = smov (!%p323_p3), 32  }
   0xa   : > { %s1114_s22 = smov (!%p323_p3), 34   ;;  %s1115_s25 = smov (!%p323_p3), 111  }
   0xb   : > { %s1116_s26 = smov (!%p323_p3), 127   ;;  %s1118_s28 = smov (!%p323_p3), 96  }
   0xc   : > { %v400_v0 = vld [vmem:[%s1442_s3] sm:$0xf]  ;;  %v1099_v1 = vmov 0   ;;  %v1100_v2 = vmov 2   ;;  %v405_v3 = vlaneseq  ;;  %s1454_s30 = smov (!%p374_p4, %s1089_s30), 1  ;;  %v1101_v5 = vmov 1  }
   0xd   : > { %1059 = vset.pattern.permute.xlu0 %v1099_v1  ;;  %1061 = vset.pattern.permute.xlu1 %v1100_v2  ;;  %v1102_v6 = vmov 3   ;;  %s1009_s15 = sshll.u32 %s1454_s30, 3  ;;  %v401_v8 = vld [vmem:[%s1443_s4] sm:$0xf]  ;;  %v1104_v23 = vmov 4   ;;  %v1105_v25 = vmov 5  }
   0xe   : > { %425 = vperm.xlu0 %1059, %v400_v0   ;;  %475 = vperm.xlu1 %1061, %v400_v0   ;;  %v1195_v4 = vshrl.u32 %v405_v3, 7  ;;  %s381_s18 = scalar_lea.vmem %s1439_s0, %s1009_s15  ;;  %v402_v9 = vld [vmem:[%s1444_s5] sm:$0xf]  ;;  %v1108_v27 = vmov 7   ;;  %v1109_v28 = vmov 6   ;;  %v1110_v29 = vmov 8  }
   0xf   : > { %v1210_v10 = vld [vmem:[%s381_s18] sm:$0xff]  ;;  %s1003_s15 = sshll.u32 %s1454_s30, 2  ;;  %vm650_vm0 = vcmask 15360   ;;  %vm571_vm1 = vcmask 138240   ;;  %vm778_vm2 = vcmask 261120   ;;  %vm580_vm3 = vcmask 7168  }
  0x10   : > { %v411_v7 = vsub.s32 4, %v1195_v4  ;;  %v436_v11 = vsub.s32 5, %v1195_v4  ;;  %v1214_v12 = vsub.s32 0, %v1195_v4  ;;  %v1006_v14 = vld [vmem:[%s1441_s2 + $0x1] ss:$2 sm:$0x3]  ;;  %s389_s18 = scalar_lea.vmem %s1440_s1, %s1003_s15 }
  0x11   : > { %v1230_v17 = vsub.s32 1, %v1195_v4  ;;  %v1238_v19 = vld [vmem:[%s1445_s6] sm:$0xf]  ;;  %v458_v30 = vsub.s32 2, %v1195_v4  ;;  %v462_v31 = vsub.s32 6, %v1195_v4  ;;  %v484_v32 = vsub.s32 3, %v1195_v4 }
  0x12   : > { %1060 = vset.pattern.permute.xlu0 %v1101_v5  ;;  %1062 = vset.pattern.permute.xlu1 %v1102_v6  ;;  %v1217_v13 = vrot.slane %v1210_v10, %v411_v7  ;;  %v1225_v15 = vrot.slane %v1006_v14, %v1214_v12  ;;  %v1233_v18 = vrot.slane %v1210_v10, %v436_v11  ;;  %v586_v22 = vld [vmem:[%s1441_s2] ss:$2 sm:$0x3]  ;;  %v488_v33 = vsub.s32 7, %v1195_v4  ;;  %s1119_s29 = smov 95   ;;  %s1122_s15 = smov 94  }
  0x13   : > { %449 = vperm.xlu0 %1060, %v400_v0   ;;  %501 = vperm.xlu1 %1062, %v400_v0   ;;  %v1247_v21 = vrot.slane %v1006_v14, %v1230_v17  ;;  %v1255_v24 = vrot.slane %v586_v22, %v1214_v12  ;;  %v1260_v26 = vrot.slane %v586_v22, %v1230_v17  ;;  %v524_v35 = vld [vmem:[%s389_s18] sm:$0xf]  ;;  %vm584_vm4 = vcmask 269312   ;;  %s1010_s18 = sshll.u32 %s1454_s30, 4 }
  0x14   : > { %v422_v16 = vrot.slane %v1217_v13, %v1214_v12  ;;  %v447_v20 = vrot.slane %v1233_v18, %v1230_v17  ;;  %v408_v34 = vrot.slane %v1210_v10, %v1214_v12  ;;  %v459_v36 = vrot.slane %v1210_v10, %v458_v30 }
  0x15   : > { %v433_v37 = vrot.slane %v1210_v10, %v1230_v17  ;;  %v463_v38 = vrot.slane %v1210_v10, %v462_v31  ;;  %v485_v39 = vrot.slane %v1210_v10, %v484_v32  ;;  %v489_v40 = vrot.slane %v1210_v10, %v488_v33 }
  0x16   : > { %v418_v43 = vrot.slane %v408_v34, %v1214_v12  ;;  %v528_v44 = vrot.slane %v524_v35, %v1214_v12  ;;  %v469_v45 = vrot.slane %v459_v36, %v458_v30  ;;  %v533_v47 = vrot.slane %v524_v35, %v1230_v17 }
  0x17   : > { %1063 = vset.pattern.permute.xlu1 %v1099_v1  ;;  %1064 = vset.pattern.permute.xlu0 %v1099_v1  ;;  %v443_v46 = vrot.slane %v433_v37, %v1230_v17  ;;  %v473_v48 = vrot.slane %v463_v38, %v458_v30  ;;  %v539_v49 = vrot.slane %v524_v35, %v458_v30  ;;  %v590_v30 = vld [vmem:[%s1446_s7] sm:$0xf]  ;;  %vm685_vm5 = vcmask 130048  }
  0x18   : > { %510 = vperm.xlu1 %1063, %v401_v8   ;;  %517 = vperm.xlu0 %1064, %v402_v9   ;;  %v495_v50 = vrot.slane %v485_v39, %v484_v32  ;;  %v499_v51 = vrot.slane %v489_v40, %v484_v32  ;;  %v545_v52 = vrot.slane %v524_v35, %v484_v32  ;;  %vm743_vm6 = vcmask 146432  }
  0x19   : > { %vm836_vm7 = vcmask 277504   ;;  %vm630_vm8 = vcmask 1039360   ;;  %vm674_vm9 = vcmask 1031168   ;;  %vm709_vm10 = vcmask 916480  }
  0x1a   : > { %vm732_vm11 = vcmask 908288   ;;  %vm767_vm12 = vcmask 900096   ;;  %vm802_vm13 = vcmask 785408   ;;  %vm825_vm14 = vcmask 777216  }
  0x1b   : > { %vm860_vm15 = vcmask 769024  }
  0x1c   : > { %1065 = vset.pattern.permute.xlu1 %v1101_v5  ;;  %646 = vrot.lane.b32.xlu0 %v1225_v15, %s1103_s27 }
  0x1d   : > { %615 = vperm.xlu1 %1065, %v1238_v19   ;;  %1067 = vset.pattern.permute.xlu0 %v1102_v6 }
  0x20   : > { %694 = vperm.xlu0 %1067, %v1238_v19  }
  0x21   : > { %1066 = vset.pattern.permute.xlu1 %v1100_v2 }
  0x22   : > { %659 = vperm.xlu1 %1066, %v1238_v19  }
  0x24   : > { %1068 = vset.pattern.permute.xlu0 %v1104_v23 }
  0x25   : > { %717 = vperm.xlu0 %1068, %v1238_v19  }
  0x26   : > { %648 = vrot.lane.b32.xlu1 %v1247_v21, %s1103_s27  ;;  %s1117_s27 = smov 126  }
  0x27   : > { %1069 = vset.pattern.permute.xlu1 %v1105_v25 }
  0x29   : > { %741 = vrot.lane.b32.xlu0 %v1247_v21, %s1106_s13 }
  0x2a   : > { %681 = vrot.lane.b32.xlu1 %v1255_v24, %s1107_s14  ;;  %1071 = vset.pattern.permute.xlu0 %v1108_v27 }
  0x2e   : > { %683 = vrot.lane.b32.xlu1 %v1260_v26, %s1107_s14  ;;  %s1121_s14 = smov 110  }
  0x32   : > { %752 = vperm.xlu1 %1069, %v1238_v19  }
  0x36   : > { %739 = vrot.lane.b32.xlu1 %v1225_v15, %s1106_s13  ;;  %s1120_s13 = smov 112  }
  0x37   : > { %1070 = vset.pattern.permute.xlu1 %v1109_v28 }
  0x3a   : > { %787 = vperm.xlu1 %1070, %v1238_v19  }
  0x3e   : > { %1072 = vset.pattern.permute.xlu1 %v1110_v29 }
  0x89   : > { %v426_v41 = vpop.permute.xlu0 %425  ;;  %v476_v42 = vpop.permute.xlu1 %475 }
  0x8a   : > { %v428_v53 = vmul.f32 %v426_v41, %v418_v43  ;;  %v429_v54 = vmul.f32 %v426_v41, %v422_v16  ;;  %v529_v55 = vmul.f32 %v528_v44, %v426_v41  ;;  %v478_v58 = vmul.f32 %v476_v42, %v469_v45 }
  0x8b   : > { %v479_v62 = vmul.f32 %v476_v42, %v473_v48  ;;  %v540_v63 = vmul.f32 %v539_v49, %v476_v42 }
  0x8e   : > { %v450_v56 = vpop.permute.xlu0 %449  ;;  %v502_v57 = vpop.permute.xlu1 %501 }
  0x8f   : > { %v452_v59 = vmul.f32 %v450_v56, %v443_v46  ;;  %v453_v60 = vmul.f32 %v450_v56, %v447_v20  ;;  %v534_v61 = vmul.f32 %v533_v47, %v450_v56  ;;  %v504_v0 = vmul.f32 %v502_v57, %v495_v50 }
  0x90   : > { %v505_v2 = vmul.f32 %v502_v57, %v499_v51  ;;  %v546_v6 = vmul.f32 %v545_v52, %v502_v57 }
  0x91   : > { %v454_v3 = vadd.f32 %v452_v59, %v428_v53  ;;  %v455_v4 = vadd.f32 %v453_v60, %v429_v54  ;;  %v535_v5 = vadd.f32 %v534_v61, %v529_v55 }
  0x93   : > { %v480_v7 = vadd.f32 %v478_v58, %v454_v3  ;;  %v481_v8 = vadd.f32 %v479_v62, %v455_v4  ;;  %v541_v9 = vadd.f32 %v540_v63, %v535_v5  ;;  %v511_v10 = vpop.permute.xlu1 %510  ;;  %v518_v14 = vpop.permute.xlu0 %517 }
  0x95   : > { %v506_v11 = vadd.f32 %v504_v0, %v480_v7  ;;  %v507_v12 = vadd.f32 %v505_v2, %v481_v8  ;;  %v547_v13 = vadd.f32 %v546_v6, %v541_v9 }
  0x97   : > { %v513_v16 = vmul.f32 %v511_v10, %v506_v11  ;;  %v514_v17 = vmul.f32 %v511_v10, %v507_v12  ;;  %v548_v18 = vmul.f32 %v547_v13, %v511_v10  ;;  %v1322_v35 = vpop.permute.xlu0 %646 }
  0x98   : > { %v616_v31 = vpop.permute.xlu1 %615 }
  0x99   : > { %v1292_v20 = vadd.f32 %v518_v14, %v514_v17  ;;  %v549_v22 = vadd.f32 %v548_v18, %v518_v14  ;;  %v1294_v23 = vadd.f32 %v518_v14, %v513_v16 }
  0x9b   : > { %v550_v25 = vmax.f32 %v549_v22, 0.0  ;;  %v523_v27 = vmax.f32 %v1292_v20, 0.0  ;;  %v522_v29 = vmax.f32 %v1294_v23, 0.0 }
  0x9d   : > { %569 = vrot.lane.b32.xlu1 %v523_v27, %s1111_s19  ;;  %v558_v28 = vmul.f32 0.0, %v550_v25  ;;  %v1314_v32 = vpop.permute.xlu1 %659 }
  0x9f   : > { %562 = vrot.lane.b32.xlu0 %v558_v28, %s1112_s20 }
  0xa1   : > { %567 = vrot.lane.b32.xlu1 %v522_v29, %s1111_s19  ;;  %v1316_v33 = vpop.permute.xlu1 %648 }
  0xa2   : > { %v651_v42 = vsel %vm650_vm0, %v1322_v35, %v1316_v33  ;;  %vm889_vm0 = vcmask 1043456  }
  0xa3   : > { %577 = vrot.lane.b32.xlu0 %v558_v28, %s1112_s20 }
  0xa5   : > { %776 = vrot.lane.b32.xlu1 %v1260_v26, %s1113_s21  ;;  %v1318_v34 = vpop.permute.xlu1 %681 }
  0xa7   : > { %774 = vrot.lane.b32.xlu0 %v1255_v24, %s1113_s21  ;;  %s398_s21 = scalar_lea.vmem %s1448_s9, %s1010_s18 }
  0xa9   : > { %845 = vperm.xlu1 %1072, %v1238_v19  }
  0xab   : > { %810 = vperm.xlu0 %1071, %v1238_v19  }
  0xad   : > { %832 = vrot.lane.b32.xlu1 %v1225_v15, %s1114_s22  ;;  %v1320_v15 = vpop.permute.xlu1 %683 }
  0xae   : > { %1073 = vset.pattern.permute.xlu1 %v1099_v1  ;;  %v686_v61 = vsel %vm685_vm5, %v1318_v34, %v1320_v15 }
  0xaf   : > { %834 = vrot.lane.b32.xlu0 %v1247_v21, %s1114_s22 }
  0xb0   : > { %1074 = vset.pattern.permute.xlu0 %v1099_v1  ;;  %v1326_v1 = vpop.permute.xlu0 %694 }
  0xb1   : > { %607 = vperm.xlu1 %1073, %v1238_v19   ;;  %v1324_v21 = vpop.permute.xlu1 %752 }
  0xb4   : > { %v1330_v36 = vpop.permute.xlu0 %717 }
  0xb5   : > { %869 = vperm.xlu1 %1073, %v590_v30   ;;  %v1328_v19 = vpop.permute.xlu1 %739 }
  0xb8   : > { %v1334_v38 = vpop.permute.xlu0 %741 }
  0xb9   : > { %v1332_v37 = vpop.permute.xlu1 %787  ;;  %v744_v3 = vsel %vm743_vm6, %v1328_v19, %v1334_v38 }
 0x10f   : > { %v570_v39 = vpop.permute.xlu1 %569 }
 0x111   : > { %v563_v40 = vpop.permute.xlu0 %562 }
 0x112   : > { %v581_v52 = vsel %vm580_vm3, 0.0, %v563_v40 }
 0x113   : > { %v568_v41 = vpop.permute.xlu1 %567 }
 0x114   : > { %v1339_v43 = vsel %vm571_vm1, %v568_v41, %v570_v39  ;;  %v1357_v55 = vsel %vm571_vm1, %v581_v52, %v568_v41 }
 0x115   : > { %v578_v44 = vpop.permute.xlu0 %577  ;;  %v721_v45 = vmul.f32 %v1330_v36, %v1339_v43  ;;  %v619_v46 = vmul.f32 %v616_v31, %v1339_v43  ;;  %v656_v47 = vmul.f32 %v651_v42, %v1339_v43  ;;  %v618_v57 = vmul.f32 %v616_v31, %v1357_v55  ;;  %v591_v42 = vld [vmem:[%s1447_s8] sm:$0xf] }
 0x116   : > { %v583_v56 = vsel %vm571_vm1, %v570_v39, %v578_v44  ;;  %v691_v0 = vmul.f32 %v686_v61, %v1339_v43  ;;  %v749_v7 = vmul.f32 %v744_v3, %v1339_v43  ;;  %v690_v10 = vmul.f32 %v1318_v34, %v1357_v55 }
 0x117   : > { %728 = vrot.lane.b32.xlu0 %v721_v45, %s1115_s25  ;;  %626 = vrot.lane.b32.xlu1 %v619_v46, %s1116_s26  ;;  %v1346_v48 = vpop.permute.xlu1 %776  ;;  %v663_v50 = vmul.f32 %v1314_v32, %v656_v47  ;;  %v585_v58 = vsel %vm584_vm4, %v583_v56, 0.0  ;;  %v748_v18 = vmul.f32 %v1328_v19, %v1357_v55  ;;  %v720_v22 = vmul.f32 %v1330_v36, %v1357_v55 }
 0x118   : > { %v620_v60 = vmul.f32 %v616_v31, %v585_v58  ;;  %v698_v6 = vmul.f32 %v1326_v1, %v691_v0  ;;  %v756_v12 = vmul.f32 %v1324_v21, %v749_v7  ;;  %v697_v13 = vmul.f32 %v1326_v1, %v690_v10 }
 0x119   : > { %v1348_v49 = vpop.permute.xlu0 %774  ;;  %v692_v14 = vmul.f32 %v1320_v15, %v585_v58  ;;  %v755_v25 = vmul.f32 %v1324_v21, %v748_v18  ;;  %v750_v28 = vmul.f32 %v1334_v38, %v585_v58  ;;  %v722_v30 = vmul.f32 %v1330_v36, %v585_v58 }
 0x11a   : > { %v779_v51 = vsel %vm778_vm2, %v1348_v49, %v1346_v48  ;;  %v655_v31 = vmul.f32 %v1322_v35, %v1357_v55  ;;  %v657_v19 = vmul.f32 %v1316_v33, %v585_v58  ;;  %v783_v36 = vmul.f32 %v1348_v49, %v1357_v55 }
 0x11b   : > { %v784_v53 = vmul.f32 %v779_v51, %v1339_v43  ;;  %670 = vrot.lane.b32.xlu0 %v663_v50, %s1117_s27  ;;  %v699_v17 = vmul.f32 %v1326_v1, %v692_v14  ;;  %v757_v15 = vmul.f32 %v1324_v21, %v750_v28  ;;  %v785_v21 = vmul.f32 %v1346_v48, %v585_v58 }
 0x11c   : > { %v662_v1 = vmul.f32 %v1314_v32, %v655_v31  ;;  %v664_v35 = vmul.f32 %v1314_v32, %v657_v19  ;;  %v790_v41 = vmul.f32 %v1332_v37, %v783_v36 }
 0x11d   : > { %v791_v54 = vmul.f32 %v1332_v37, %v784_v53  ;;  %v792_v33 = vmul.f32 %v1332_v37, %v785_v21 }
 0x11f   : > { %798 = vrot.lane.b32.xlu0 %v791_v54, %s1118_s28 }
 0x123   : > { %624 = vrot.lane.b32.xlu0 %v618_v57, %s1116_s26 }
 0x124   : > { %v846_v59 = vpop.permute.xlu1 %845 }
 0x126   : > { %v811_v62 = vpop.permute.xlu0 %810 }
 0x127   : > { %v814_v63 = vmul.f32 %v811_v62, %v1339_v43  ;;  %628 = vrot.lane.b32.xlu0 %v620_v60, %s1116_s26  ;;  %v813_v2 = vmul.f32 %v811_v62, %v1357_v55  ;;  %v815_v9 = vmul.f32 %v811_v62, %v585_v58  ;;  %v603_v60 = vmul.f32 %v1255_v24, %v1357_v55 }
 0x128   : > { %v833_v5 = vpop.permute.xlu1 %832 }
 0x129   : > { %821 = vrot.lane.b32.xlu1 %v814_v63, %s1119_s29  ;;  %v841_v34 = vmul.f32 %v833_v5, %v1357_v55 }
 0x12a   : > { %v835_v4 = vpop.permute.xlu0 %834 }
 0x12b   : > { %819 = vrot.lane.b32.xlu0 %v813_v2, %s1119_s29  ;;  %v837_v8 = vsel %vm836_vm7, %v833_v5, %v835_v4  ;;  %v848_v39 = vmul.f32 %v846_v59, %v841_v34  ;;  %v843_v40 = vmul.f32 %v835_v4, %v585_v58  ;;  %v604_v2 = vmul.f32 %v1260_v26, %v1339_v43 }
 0x12c   : > { %v842_v11 = vmul.f32 %v837_v8, %v1339_v43  ;;  %v608_v44 = vpop.permute.xlu1 %607 }
 0x12d   : > { %705 = vrot.lane.b32.xlu1 %v698_v6, %s1120_s13  ;;  %v850_v38 = vmul.f32 %v846_v59, %v843_v40  ;;  %v610_v63 = vmul.f32 %v608_v44, %v603_v60  ;;  %v611_v7 = vmul.f32 %v608_v44, %v604_v2 }
 0x12e   : > { %v849_v16 = vmul.f32 %v846_v59, %v842_v11 }
 0x12f   : > { %823 = vrot.lane.b32.xlu0 %v815_v9, %s1119_s29 }
 0x130   : > { %v1406_v46 = vpop.permute.xlu1 %869 }
 0x131   : > { %763 = vrot.lane.b32.xlu1 %v756_v12, %s1121_s14 }
 0x133   : > { %703 = vrot.lane.b32.xlu0 %v697_v13, %s1120_s13 }
 0x135   : > { %856 = vrot.lane.b32.xlu1 %v849_v16, %s1122_s15 }
 0x137   : > { %707 = vrot.lane.b32.xlu0 %v699_v17, %s1120_s13 }
 0x139   : > { %726 = vrot.lane.b32.xlu1 %v720_v22, %s1115_s25 }
 0x13b   : > { %761 = vrot.lane.b32.xlu0 %v755_v25, %s1121_s14 }
 0x13d   : > { %730 = vrot.lane.b32.xlu1 %v722_v30, %s1115_s25 }
 0x13f   : > { %765 = vrot.lane.b32.xlu0 %v757_v15, %s1121_s14 }
 0x141   : > { %668 = vrot.lane.b32.xlu1 %v662_v1, %s1117_s27 }
 0x143   : > { %854 = vrot.lane.b32.xlu0 %v848_v39, %s1122_s15 }
 0x145   : > { %672 = vrot.lane.b32.xlu1 %v664_v35, %s1117_s27 }
 0x147   : > { %858 = vrot.lane.b32.xlu0 %v850_v38, %s1122_s15 }
 0x149   : > { %796 = vrot.lane.b32.xlu1 %v790_v41, %s1118_s28 }
 0x14d   : > { %800 = vrot.lane.b32.xlu1 %v792_v33, %s1118_s28 }
 0x151   : > { %876 = vperm.xlu1 %1073, %v591_v42  }
 0x189   : > { %v729_v32 = vpop.permute.xlu0 %728  ;;  %v627_v49 = vpop.permute.xlu1 %626 }
 0x18d   : > { %v671_v45 = vpop.permute.xlu0 %670 }
 0x191   : > { %v799_v47 = vpop.permute.xlu0 %798 }
 0x195   : > { %v625_v48 = vpop.permute.xlu0 %624 }
 0x196   : > { %v631_v62 = vsel %vm630_vm8, %v625_v48, %v627_v49 }
 0x197   : > { %v635_v3 = vadd.f32 %v631_v62, %v610_v63 }
 0x199   : > { %v629_v50 = vpop.permute.xlu0 %628 }
 0x19a   : > { %v632_v5 = vsel %vm630_vm8, %v627_v49, %v629_v50 }
 0x19b   : > { %v822_v51 = vpop.permute.xlu1 %821  ;;  %v636_v24 = vadd.f32 %v632_v5, %v611_v7 }
 0x19d   : > { %v820_v52 = vpop.permute.xlu0 %819 }
 0x19e   : > { %v826_v36 = vsel %vm825_vm14, %v820_v52, %v822_v51 }
 0x19f   : > { %v706_v53 = vpop.permute.xlu1 %705 }
 0x1a1   : > { %v824_v37 = vpop.permute.xlu0 %823 }
 0x1a2   : > { %v827_v35 = vsel %vm825_vm14, %v822_v51, %v824_v37 }
 0x1a3   : > { %v764_v54 = vpop.permute.xlu1 %763 }
 0x1a5   : > { %v704_v56 = vpop.permute.xlu0 %703 }
 0x1a6   : > { %v710_v9 = vsel %vm709_vm10, %v704_v56, %v706_v53 }
 0x1a7   : > { %v857_v57 = vpop.permute.xlu1 %856 }
 0x1a9   : > { %v708_v58 = vpop.permute.xlu0 %707 }
 0x1aa   : > { %v711_v14 = vsel %vm709_vm10, %v706_v53, %v708_v58 }
 0x1ab   : > { %v727_v59 = vpop.permute.xlu1 %726 }
 0x1ac   : > { %v733_v12 = vsel %vm732_vm11, %v727_v59, %v729_v32 }
 0x1ad   : > { %v762_v0 = vpop.permute.xlu0 %761 }
 0x1ae   : > { %v768_v16 = vsel %vm767_vm12, %v762_v0, %v764_v54 }
 0x1af   : > { %v731_v61 = vpop.permute.xlu1 %730 }
 0x1b0   : > { %v734_v25 = vsel %vm732_vm11, %v729_v32, %v731_v61 }
 0x1b1   : > { %v766_v55 = vpop.permute.xlu0 %765 }
 0x1b2   : > { %v769_v34 = vsel %vm767_vm12, %v764_v54, %v766_v55 }
 0x1b3   : > { %v669_v4 = vpop.permute.xlu1 %668 }
 0x1b4   : > { %v675_v6 = vsel %vm674_vm9, %v669_v4, %v671_v45 }
 0x1b5   : > { %v679_v8 = vadd.f32 %v675_v6, %v635_v3  ;;  %v855_v30 = vpop.permute.xlu0 %854 }
 0x1b6   : > { %v861_v33 = vsel %vm860_vm15, %v855_v30, %v857_v57 }
 0x1b7   : > { %v714_v10 = vadd.f32 %v710_v9, %v679_v8  ;;  %v673_v11 = vpop.permute.xlu1 %672 }
 0x1b8   : > { %v676_v26 = vsel %vm674_vm9, %v671_v45, %v673_v11 }
 0x1b9   : > { %v680_v43 = vadd.f32 %v676_v26, %v636_v24  ;;  %v737_v13 = vadd.f32 %v733_v12, %v714_v10  ;;  %v859_v38 = vpop.permute.xlu0 %858 }
 0x1ba   : > { %v862_v42 = vsel %vm860_vm15, %v857_v57, %v859_v38 }
 0x1bb   : > { %v715_v17 = vadd.f32 %v711_v14, %v680_v43  ;;  %v772_v18 = vadd.f32 %v768_v16, %v737_v13  ;;  %v797_v22 = vpop.permute.xlu1 %796 }
 0x1bc   : > { %v803_v28 = vsel %vm802_vm13, %v797_v22, %v799_v47 }
 0x1bd   : > { %v738_v31 = vadd.f32 %v734_v25, %v715_v17  ;;  %v807_v15 = vadd.f32 %v803_v28, %v772_v18 }
 0x1bf   : > { %v773_v1 = vadd.f32 %v769_v34, %v738_v31  ;;  %v801_v19 = vpop.permute.xlu1 %800  ;;  %v830_v21 = vadd.f32 %v826_v36, %v807_v15 }
 0x1c0   : > { %v804_v39 = vsel %vm802_vm13, %v799_v47, %v801_v19 }
 0x1c1   : > { %v808_v40 = vadd.f32 %v804_v39, %v773_v1  ;;  %v865_v32 = vadd.f32 %v861_v33, %v830_v21 }
 0x1c3   : > { %v831_v41 = vadd.f32 %v827_v35, %v808_v40  ;;  %v872_v45 = vmul.f32 %v1406_v46, %v865_v32 }
 0x1c5   : > { %v866_v44 = vadd.f32 %v862_v42, %v831_v41 }
 0x1c7   : > { %v873_v48 = vmul.f32 %v1406_v46, %v866_v44 }
 0x1cc   : > { %v877_v49 = vpop.permute.xlu1 %876 }
 0x1cd   : > { %v879_v50 = vadd.f32 %v877_v49, %v872_v45  ;;  %v880_v53 = vadd.f32 %v877_v49, %v873_v48 }
 0x1cf   : > { %v881_v47 = vmax.f32 %v879_v50, 0.0  ;;  %v882_v54 = vmax.f32 %v880_v53, 0.0 }
 0x1d1   : > { %v885_v51 = vrot.slane %v881_v47, 4  ;;  %v886_v52 = vrot.slane %v882_v54, 4 }
 0x1d3   : > { %v890_v37 = vsel %vm889_vm0, %v522_v29, %v885_v51  ;;  %v891_v56 = vsel %vm889_vm0, %v523_v27, %v886_v52 }
 0x1d4   : > { %892 = vst [vmem:[%s398_s21] sm:$0xff] %v890_v37  ;;  %893 = vst [vmem:[%s398_s21 + $0x8] sm:$0xff] %v891_v56 }
 0x1d5 PF: > { %s19_s11 = sadd.s32 1, %s1097_s11   ;;  %s1449_s30 = smov %s1093_s10 }
 0x1d6   : > { %p16_p5 = scmp.ge.s32.totalorder %s19_s11, 4   ;;  %s1450_s10 = smov %s1452_s12 }
 0x1d8   :  { %18 = sbr.rel (!%p16_p5) target bundleno = 2 (0x2), region = 90 }

</bundles_post_ra>
